<compile_context>
chip_gen: v7x
topology: tpu7x:2x2x1
jax: 0.10.0
libtpu: 0.0.40
codegen_flags: <defaults>
</compile_context>

<pallas_src>
import jax
import jax.numpy as jnp
from jax.experimental import pallas as pl
from jax.experimental.pallas import tpu as pltpu


# ----------------------------- kernel ---------------------------------------


def mlp_kernel(x_ref, w1t_ref, w2t_ref, wdt_ref, s_ref, xr_ref):
    # x_ref:   [TB, M]  compute dtype (bf16 by default)
    # w1t_ref: [M,  h]  encoder.0 weight^T
    # w2t_ref: [h,  N]  encoder.2 weight^T
    # wdt_ref: [N,  M]  decoder weight^T with 1/(||col||+eps) pre-folded
    # s_ref:   [TB, N]  S_   (encoder output)
    # xr_ref:  [TB, M]  X_   (decoder output)
    x = x_ref[...]

    # encoder: Linear(M, h) + ReLU   (MXU matmul, fp32 accumulate)
    h1 = jnp.dot(x, w1t_ref[...], preferred_element_type=jnp.float32)
    h1 = jnp.maximum(h1, 0.0)

    # encoder: Linear(h, N) + ReLU
    s = jnp.dot(h1.astype(w2t_ref.dtype), w2t_ref[...],
                preferred_element_type=jnp.float32)
    s = jnp.maximum(s, 0.0)
    s_ref[...] = s.astype(s_ref.dtype)

    # decoder with column-normalized weight (scale already folded into wdt)
    xr = jnp.dot(s.astype(wdt_ref.dtype), wdt_ref[...],
                 preferred_element_type=jnp.float32)
    xr_ref[...] = xr.astype(xr_ref.dtype)


# ----------------------------- helpers --------------------------------------


def _round_up(n, m):
    return -(-n // m) * m


def _vmem_capacity_bytes():
    try:
        return int(pltpu.get_tpu_info().vmem_capacity_bytes)
    except Exception:
        return 64 * 1024 * 1024  # conservative: v7x has 64 MiB per TensorCore


def _vmem_estimate_bytes(tile, M, h, N, compute_bytes, out_bytes):
    act_in = 2 * tile * M * compute_bytes               # X tile, double-buffered
    act_out = 2 * tile * (N + M) * out_bytes            # S_/X_ tiles, double-buffered
    weights = 2 * (M * h + h * N + N * M) * compute_bytes  # default double-buffering
    temps = tile * (h + N + M) * 4                      # fp32 h1 / s / xr intermediates
    return act_in + act_out + weights + temps


def prepare_mlp_weights(w1, w2, wd, *, compute_dtype=jnp.bfloat16):
    """One-time weight prep, hoisted out of the per-call hot path.

    w1: [h, M] (encoder.0.weight), w2: [N, h] (encoder.2.weight), wd: [M, N]
    (decoder.weight).  Folds the decoder column normalization into Wd^T:
        S @ (Wd / (||Wd col|| + 1e-12))^T == S @ (inv[:, None] * Wd^T)
    """
    inv = 1.0 / (jnp.linalg.norm(wd.astype(jnp.float32), axis=0) + 1e-12)   # [N]
    w1t = w1.T.astype(compute_dtype)                                        # [M, h]
    w2t = w2.T.astype(compute_dtype)                                        # [h, N]
    wdt = (wd.astype(jnp.float32).T * inv[:, None]).astype(compute_dtype)   # [N, M]
    return w1t, w2t, wdt


# ----------------------------- wrapper ---------------------------------------


def mlp_forward_prepared(x, w1t, w2t, wdt, *, batch_tile=None,
                         out_dtype=jnp.float32):
    """x: [B, M]; prepared weights from prepare_mlp_weights. Returns (S_, X_)."""
    B, M = x.shape
    Mw, h = w1t.shape
    hw, N = w2t.shape
    assert Mw == M and hw == h and wdt.shape == (N, M)

    compute_dtype = w1t.dtype
    compute_bytes = jnp.dtype(compute_dtype).itemsize
    out_bytes = jnp.dtype(out_dtype).itemsize

    xc = x.astype(compute_dtype)
    cap = _vmem_capacity_bytes()

    # --- batch tile: as large as the VMEM budget allows (default target 512),
    #     but keep at least 2 grid steps so pipelining overlaps DMA with compute
    #     and v7x's two TensorCores both get work on the "parallel" axis.
    Bp8 = _round_up(B, 8)
    if batch_tile is None:
        tile = min(512, Bp8)
        if Bp8 >= 16 and tile > Bp8 // 2:
            tile = _round_up(Bp8 // 2, 8)
        budget = int(0.4 * cap)
        while tile > 128 and _vmem_estimate_bytes(
                tile, M, h, N, compute_bytes, out_bytes) > budget:
            tile = _round_up(tile // 2, 8)
        batch_tile = tile
    batch_tile = max(8, _round_up(batch_tile, 8))

    # Pad only the batch dim; feature dims stay at true width (block last dim ==
    # full array dim is legal), so no pad/slice HBM passes over X / S_ / X_.
    pad = (-B) % batch_tile
    if pad:
        xc = jnp.pad(xc, ((0, pad), (0, 0)))
    Bp = B + pad
    grid = (Bp // batch_tile,)

    est = _vmem_estimate_bytes(batch_tile, M, h, N, compute_bytes, out_bytes)
    vmem_limit = int(min(max(2 * est + (1 << 20), 8 << 20), int(0.85 * cap)))

    def const_spec(shape):
        # Grid-invariant weight blocks (same block index every step).
        return pl.BlockSpec(shape, lambda i: (0, 0))

    S_p, X_p = pl.pallas_call(
        mlp_kernel,
        out_shape=(
            jax.ShapeDtypeStruct((Bp, N), out_dtype),  # S_
            jax.ShapeDtypeStruct((Bp, M), out_dtype),  # X_
        ),
        grid_spec=pltpu.PrefetchScalarGridSpec(
            num_scalar_prefetch=0,
            grid=grid,
            in_specs=[
                pl.BlockSpec((batch_tile, M), lambda i: (i, 0)),  # X tile
                const_spec((M, h)),                               # W1^T
                const_spec((h, N)),                               # W2^T
                const_spec((N, M)),                               # scaled Wd^T
            ],
            out_specs=[
                pl.BlockSpec((batch_tile, N), lambda i: (i, 0)),
                pl.BlockSpec((batch_tile, M), lambda i: (i, 0)),
            ],
        ),
        compiler_params=pltpu.CompilerParams(
            # batch tiles are independent -> shard across TensorCores (v7x).
            dimension_semantics=("parallel",),
            vmem_limit_bytes=vmem_limit,
        ),
    )(xc, w1t, w2t, wdt)

    if pad:
        S_p = S_p[:B]
        X_p = X_p[:B]
    return S_p, X_p


def mlp_forward(x, w1, w2, wd, *, batch_tile=None, compute_dtype=jnp.bfloat16,
                out_dtype=jnp.float32):
    """Convenience wrapper: prep weights then run the kernel.  For repeated
    calls with fixed weights, call prepare_mlp_weights once and use
    mlp_forward_prepared directly."""
    w1t, w2t, wdt = prepare_mlp_weights(w1, w2, wd, compute_dtype=compute_dtype)
    return mlp_forward_prepared(x, w1t, w2t, wdt, batch_tile=batch_tile,
                                out_dtype=out_dtype)


def init_params(M, N, h, key):
    """Deterministic synthetic init mirroring the module's parameter shapes."""
    k1, k2, k3 = jax.random.split(key, 3)
    # nn.Linear(M, h) weight: [h, M]; nn.Linear(h, N) weight: [N, h] (no bias)
    w1 = jax.random.uniform(k1, (h, M), jnp.float32, -1.0, 1.0) / jnp.sqrt(M)
    w2 = jax.random.uniform(k2, (N, h), jnp.float32, -1.0, 1.0) / jnp.sqrt(h)
    # decoder weight: [M, N], normal(0, 0.02)
    wd = 0.02 * jax.random.normal(k3, (M, N), jnp.float32)
    return w1, w2, wd


if __name__ == "__main__":
    B, M, h, N = 512, 32, 64, 16

    key = jax.random.PRNGKey(0)
    kx, kp = jax.random.split(key)
    x = jax.random.normal(kx, (B, M), jnp.float32)
    w1, w2, wd = init_params(M, N, h, kp)

    # One-time weight prep (hoisted), then the kernel call.
    w1t, w2t, wdt = prepare_mlp_weights(w1, w2, wd)
    S_, X_ = mlp_forward_prepared(x, w1t, w2t, wdt)   # batch_tile=256 -> grid (2,)
    jax.block_until_ready((S_, X_))

    # Reference mirroring the kernel's precision (bf16 matmul inputs, fp32 accumulate).
    cd = jnp.bfloat16
    h_ref = jnp.maximum(jnp.dot(x.astype(cd), w1t,
                                preferred_element_type=jnp.float32), 0.0)
    s_ref = jnp.maximum(jnp.dot(h_ref.astype(cd), w2t,
                                preferred_element_type=jnp.float32), 0.0)
    x_ref = jnp.dot(s_ref.astype(cd), wdt, preferred_element_type=jnp.float32)
    assert jnp.allclose(S_, s_ref, atol=2e-3, rtol=2e-3)
    assert jnp.allclose(X_, x_ref, atol=2e-3, rtol=2e-3)

    # Loose sanity check against the pure-fp32 torch-equivalent math.
    # (bf16 MXU inputs with fp32 accumulation deviate slightly from fp32 parity;
    #  pass compute_dtype=jnp.float32 to mlp_forward for strict parity.)
    h32 = jnp.maximum(x @ w1.T, 0.0)
    s32 = jnp.maximum(h32 @ w2.T, 0.0)
    wd_n = wd / (jnp.linalg.norm(wd, axis=0, keepdims=True) + 1e-12)
    x32 = s32 @ wd_n.T
    assert jnp.allclose(S_, s32, atol=5e-2, rtol=5e-2)
    assert jnp.allclose(X_, x32, atol=5e-2, rtol=5e-2)

    print("KERNEL_OK")
</pallas_src>

<mosaic_0001>
module attributes {stable_mosaic.version = 11 : i64} {
  func.func @mlp_kernel(%arg0: i32, %arg1: memref<256x32xbf16, #tpu.memory_space<vmem>>, %arg2: memref<32x64xbf16, #tpu.memory_space<vmem>>, %arg3: memref<64x16xbf16, #tpu.memory_space<vmem>>, %arg4: memref<16x32xbf16, #tpu.memory_space<vmem>>, %arg5: memref<256x16xf32, #tpu.memory_space<vmem>>, %arg6: memref<256x32xf32, #tpu.memory_space<vmem>>) attributes {dimension_semantics = [#tpu.dimension_semantics<parallel>], iteration_bounds = array<i64: 2>, scalar_prefetch = 0 : i64, scratch_operands = 0 : i64, tpu.core_type = #tpu.core_type<tc>, window_params = [{transform_indices = @transform_0, window_bounds = array<i64: 256, 32>}, {pipeline_mode = #tpu.pipeline_mode<synchronous>, transform_indices = @transform_1, window_bounds = array<i64: 32, 64>}, {pipeline_mode = #tpu.pipeline_mode<synchronous>, transform_indices = @transform_2, window_bounds = array<i64: 64, 16>}, {pipeline_mode = #tpu.pipeline_mode<synchronous>, transform_indices = @transform_3, window_bounds = array<i64: 16, 32>}, {transform_indices = @transform_4, window_bounds = array<i64: 256, 16>}, {transform_indices = @transform_5, window_bounds = array<i64: 256, 32>}]} {
    %c0 = arith.constant 0 : index
    %c0_0 = arith.constant 0 : index
    %0 = vector.load %arg1[%c0, %c0_0] : memref<256x32xbf16, #tpu.memory_space<vmem>>, vector<256x32xbf16>
    %c0_1 = arith.constant 0 : index
    %c0_2 = arith.constant 0 : index
    %1 = vector.load %arg2[%c0_1, %c0_2] : memref<32x64xbf16, #tpu.memory_space<vmem>>, vector<32x64xbf16>
    %cst = arith.constant dense<0.000000e+00> : vector<256x64xf32>
    %2 = tpu.matmul %0, %1, %cst {dimension_numbers = #tpu.dot_dimension_numbers<[1], [0], [0], [1], [0, 0, 1, 1], [], []>} : vector<256x32xbf16>, vector<32x64xbf16>, vector<256x64xf32> -> vector<256x64xf32>
    %cst_3 = arith.constant 0.000000e+00 : f32
    %3 = vector.broadcast %cst_3 : f32 to vector<256x64xf32>
    %4 = arith.maximumf %2, %3 : vector<256x64xf32>
    %5 = arith.truncf %4 : vector<256x64xf32> to vector<256x64xbf16>
    %c0_4 = arith.constant 0 : index
    %c0_5 = arith.constant 0 : index
    %6 = vector.load %arg3[%c0_4, %c0_5] : memref<64x16xbf16, #tpu.memory_space<vmem>>, vector<64x16xbf16>
    %cst_6 = arith.constant dense<0.000000e+00> : vector<256x16xf32>
    %7 = tpu.matmul %5, %6, %cst_6 {dimension_numbers = #tpu.dot_dimension_numbers<[1], [0], [0], [1], [0, 0, 1, 1], [], []>} : vector<256x64xbf16>, vector<64x16xbf16>, vector<256x16xf32> -> vector<256x16xf32>
    %cst_7 = arith.constant 0.000000e+00 : f32
    %8 = vector.broadcast %cst_7 : f32 to vector<256x16xf32>
    %9 = arith.maximumf %7, %8 : vector<256x16xf32>
    %c0_8 = arith.constant 0 : index
    %c0_9 = arith.constant 0 : index
    %10 = vector.load %arg5[%c0_8, %c0_9] : memref<256x16xf32, #tpu.memory_space<vmem>>, vector<256x16xf32>
    tpu.vector_store %arg5[%c0_8, %c0_9], %9 {strides = array<i32>} : memref<256x16xf32, #tpu.memory_space<vmem>>, vector<256x16xf32>,
    %11 = arith.truncf %9 : vector<256x16xf32> to vector<256x16xbf16>
    %c0_10 = arith.constant 0 : index
    %c0_11 = arith.constant 0 : index
    %12 = vector.load %arg4[%c0_10, %c0_11] : memref<16x32xbf16, #tpu.memory_space<vmem>>, vector<16x32xbf16>
    %cst_12 = arith.constant dense<0.000000e+00> : vector<256x32xf32>
    %13 = tpu.matmul %11, %12, %cst_12 {dimension_numbers = #tpu.dot_dimension_numbers<[1], [0], [0], [1], [0, 0, 1, 1], [], []>} : vector<256x16xbf16>, vector<16x32xbf16>, vector<256x32xf32> -> vector<256x32xf32>
    %c0_13 = arith.constant 0 : index
    %c0_14 = arith.constant 0 : index
    %14 = vector.load %arg6[%c0_13, %c0_14] : memref<256x32xf32, #tpu.memory_space<vmem>>, vector<256x32xf32>
    tpu.vector_store %arg6[%c0_13, %c0_14], %13 {strides = array<i32>} : memref<256x32xf32, #tpu.memory_space<vmem>>, vector<256x32xf32>,
    return
  }
  func.func @transform_0(%arg0: i32) -> (i32, i32) {
    %c0_i32 = arith.constant 0 : i32
    %c0_i32_0 = arith.constant 0 : i32
    return %arg0, %c0_i32 : i32, i32
  }
  func.func @transform_1(%arg0: i32) -> (i32, i32) {
    %c0_i32 = arith.constant 0 : i32
    %c0_i32_0 = arith.constant 0 : i32
    %c0_i32_1 = arith.constant 0 : i32
    return %c0_i32, %c0_i32_0 : i32, i32
  }
  func.func @transform_2(%arg0: i32) -> (i32, i32) {
    %c0_i32 = arith.constant 0 : i32
    %c0_i32_0 = arith.constant 0 : i32
    %c0_i32_1 = arith.constant 0 : i32
    return %c0_i32, %c0_i32_0 : i32, i32
  }
  func.func @transform_3(%arg0: i32) -> (i32, i32) {
    %c0_i32 = arith.constant 0 : i32
    %c0_i32_0 = arith.constant 0 : i32
    %c0_i32_1 = arith.constant 0 : i32
    return %c0_i32, %c0_i32_0 : i32, i32
  }
  func.func @transform_4(%arg0: i32) -> (i32, i32) {
    %c0_i32 = arith.constant 0 : i32
    %c0_i32_0 = arith.constant 0 : i32
    return %arg0, %c0_i32 : i32, i32
  }
  func.func @transform_5(%arg0: i32) -> (i32, i32) {
    %c0_i32 = arith.constant 0 : i32
    %c0_i32_0 = arith.constant 0 : i32
    return %arg0, %c0_i32 : i32, i32
  }
}

</mosaic_0001>

<bundles_post_ra>
// kernel: tpu_custom_call.1
= control target key start
LH: loop header
LB: loop body
LE: loop exit
PB: predicated region body
PF: predicated region fallthrough
CT: control target
= control target key end

     0   :  { %s1613_s18 = smov 0   ;;  %s1860_s0 = inlined_call_operand.vmem [shape: bf16[512,32], index: 0, kind: input, shape index: {}]   ;;  %s1861_s1 = inlined_call_operand.vmem [shape: bf16[32,64], index: 1, kind: input, shape index: {}]   ;;  %s1862_s2 = inlined_call_operand.vmem [shape: bf16[64,16], index: 2, kind: input, shape index: {}]   ;;  %s1863_s3 = inlined_call_operand.vmem [shape: bf16[16,32], index: 3, kind: input, shape index: {}]   ;;  %s1864_s4 = inlined_call_operand.vmem [shape: f32[512,16], index: 4, kind: output, shape index: {0}]   ;;  %s1865_s5 = inlined_call_operand.vmem [shape: f32[512,32], index: 5, kind: output, shape index: {1}]  }
   0x1 LB: > { %s1291_s19 = sadd.s32 4294967295, %s1581_s18   ;;  %p1295_p0 = scmp.ge.s32.totalorder %s1581_s18, 1  ;;  %s1581_s18 = sphi %s1613_s18, %s16_s18  }
   0x2   : > { %p191_p1 = scmp.lt.s32.totalorder %s1581_s18, 3 }
   0x4   : > { %p192_p2 = pnand %p1295_p0, %p191_p1 }
   0x5   : > { %v1552_v0 = vld [vmem:[%s1861_s1] sm:$0xff] (!%p192_p2)   ;;  %s1296_s22 = sshll.u32 (!%p192_p2), %s1291_s19, 5  ;;  %v1553_v1 = vld [vmem:[%s1861_s1 + $0x8] sm:$0xff] (!%p192_p2)   ;;  %vm371_vm0 = vcmask (!%p192_p2), 261120   ;;  %v1572_v12 = vld [vmem:[%s1862_s2 + $0x10] sm:$0xff] (!%p192_p2)   ;;  %vm661_vm1 = vcmask (!%p192_p2), 523264  }
   0x6   : > { %195 = sbr.rel (%p192_p2) target bundleno = 730 (0x2da), region = 36  ;;  %p225_p3 = scmp.lt.s32.totalorder (!%p192_p2), %s1296_s22, 63  ;;  %1430 = vmatprep.subr.bf16.mxu0 (!%p192_p2), %v1552_v0  ;;  %1540 = vmatprep.subr.bf16.mxu1 (!%p192_p2), %v1552_v0  ;;  %v1570_v2 = vld [vmem:[%s1862_s2] sm:$0xff] (!%p192_p2)   ;;  %v1571_v9 = vld [vmem:[%s1862_s2 + $0x8] sm:$0xff] (!%p192_p2)   ;;  %v1573_v21 = vld [vmem:[%s1862_s2 + $0x18] sm:$0xff] (!%p192_p2)   ;;  %vm903_vm2 = vcmask (!%p192_p2), 130048  }
   0x7   : > { %1431 = vmatpush3.bf16.msra.mxu0 (!%p192_p2), %v1552_v0  ;;  %1542 = vmatpush3.bf16.msra.mxu1 (!%p192_p2), %v1552_v0  ;;  %v1574_v22 = vld [vmem:[%s1863_s3] sm:$0xff] (!%p192_p2)  }
   0x8   : > { %1432 = vmatprep.subr.bf16.mxu0 (!%p192_p2), %v1553_v1  ;;  %1541 = vmatprep.subr.bf16.mxu1 (!%p192_p2), %v1553_v1 }
   0xb   : > { %1433 = vmatpush3.bf16.msra.mxu0 (!%p192_p2), %v1553_v1  ;;  %1543 = vmatpush3.bf16.msra.mxu1 (!%p192_p2), %v1553_v1 }
   0xc   : > { %1466 = vmatprep.subr.bf16.mxu1 (!%p192_p2), %v1570_v2  ;;  %1506 = vmatprep.subr.bf16.mxu0 (!%p192_p2), %v1574_v22 }
   0xd   : > { %s1867_s22 = smov (!%p225_p3, %s1296_s22), 63 }
   0xe   : > { %s1297_s27 = sshll.u32 %s1867_s22, 2  ;;  %s1299_s14 = sshll.u32 %s1867_s22, 3 }
   0xf   : > { %s1636_s30 = scalar_lea.vmem %s1860_s0, %s1297_s27  ;;  %s1704_s17 = scalar_lea.vmem %s1864_s4, %s1299_s14 }
  0x10   : > { %v1554_v3 = vld [vmem:[%s1636_s30] sm:$0xff]   ;;  %v1555_v4 = vld [vmem:[%s1636_s30 + $0x8] sm:$0xff]   ;;  %v1556_v5 = vld [vmem:[%s1636_s30 + $0x10] sm:$0xff]   ;;  %s1791_s21 = scalar_lea.vmem %s1865_s5, %s1299_s14 }
  0x11   : > { %1434 = vmatprep.mubr.msk.bf16.mxu0 %vm371_vm0, %v1554_v3  ;;  %v1557_v6 = vld [vmem:[%s1636_s30 + $0x18] sm:$0xff]   ;;  %v1558_v7 = vld [vmem:[%s1636_s30 + $0x20] sm:$0xff]   ;;  %v1563_v10 = vld [vmem:[%s1636_s30 + $0x48] sm:$0xff]  }
  0x12   : > { %1435 = vmatmul.mubr.msk.bf16.vlgmr.msra.gmra.mrb[0].mxu0 %vm371_vm0, %v1555_v4  ;;  %v1562_v8 = vld [vmem:[%s1636_s30 + $0x40] sm:$0xff]   ;;  %v1564_v11 = vld [vmem:[%s1636_s30 + $0x50] sm:$0xff]   ;;  %v1559_v13 = vld [vmem:[%s1636_s30 + $0x28] sm:$0xff]  }
  0x13   : > { %1438 = vmatprep.mubr.msk.bf16.mxu0 %vm371_vm0, %v1556_v5  ;;  %1450 = vmatprep.mubr.msk.bf16.mxu1 %vm371_vm0, %v1562_v8  ;;  %v1565_v14 = vld [vmem:[%s1636_s30 + $0x58] sm:$0xff]   ;;  %v1560_v15 = vld [vmem:[%s1636_s30 + $0x30] sm:$0xff]   ;;  %v1566_v16 = vld [vmem:[%s1636_s30 + $0x60] sm:$0xff]  }
  0x14   : > { %1451 = vmatmul.mubr.msk.bf16.vlgmr.msra.gmra.mrb[0].mxu1 %vm371_vm0, %v1563_v10  ;;  %v1561_v17 = vld [vmem:[%s1636_s30 + $0x38] sm:$0xff]   ;;  %v1567_v18 = vld [vmem:[%s1636_s30 + $0x68] sm:$0xff]   ;;  %v1568_v19 = vld [vmem:[%s1636_s30 + $0x70] sm:$0xff]   ;;  %1507 = vmatpush3.bf16.msra.mxu0 %v1574_v22 }
  0x15   : > { %1454 = vmatprep.mubr.msk.bf16.mxu1 %vm371_vm0, %v1564_v11  ;;  %1467 = vmatpush3.bf16.msra.mxu1 %v1570_v2  ;;  %v1569_v20 = vld [vmem:[%s1636_s30 + $0x78] sm:$0xff]  }
  0x16   : > { %1468 = vmatprep.subr.bf16.mxu1 %v1571_v9 }
  0x19   : > { %1469 = vmatpush3.bf16.msra.mxu1 %v1571_v9 }
  0x1a   : > { %1439 = vmatmul.mubr.msk.bf16.gmra.mrb[4].mxu0 %vm371_vm0, %v1557_v6  ;;  %1470 = vmatprep.subr.bf16.mxu1 %v1572_v12 }
  0x1b   : > { %1442 = vmatprep.mubr.msk.bf16.mxu0 %vm371_vm0, %v1558_v7 }
  0x1c   : > { %1455 = vmatmul.mubr.msk.bf16.gmra.mrb[4].mxu1 %vm371_vm0, %v1565_v14 }
  0x1d   : > { %1458 = vmatprep.mubr.msk.bf16.mxu1 %vm371_vm0, %v1566_v16  ;;  %1471 = vmatpush3.bf16.msra.mxu1 %v1572_v12 }
  0x1e   : > { %1472 = vmatprep.subr.bf16.mxu1 %v1573_v21 }
  0x21   : > { %1473 = vmatpush3.bf16.msra.mxu1 %v1573_v21 }
  0x22   : > { %1443 = vmatmul.mubr.msk.bf16.gmra.mrb[8].mxu0 %vm371_vm0, %v1559_v13 }
  0x23   : > { %1446 = vmatprep.mubr.msk.bf16.mxu0 %vm371_vm0, %v1560_v15 }
  0x24   : > { %1459 = vmatmul.mubr.msk.bf16.gmra.mrb[8].mxu1 %vm371_vm0, %v1567_v18 }
  0x25   : > { %1462 = vmatprep.mubr.msk.bf16.mxu1 %vm371_vm0, %v1568_v19 }
  0x2a   : > { %1447 = vmatmul.mubr.msk.bf16.gmra.mrb[12].mxu0 %vm371_vm0, %v1561_v17 }
  0x2c   : > { %1463 = vmatmul.mubr.msk.bf16.gmra.mrb[12].mxu1 %vm371_vm0, %v1569_v20 }
  0xe5   : > { %v1436_v23 = vpop.f32.mrb[0].mxu0 }
  0xe6   : > { %v454_v24 = vpop.f32.mrb[1].mxu0  ;;  %v583_v26 = vmax.f32 %v1436_v23, 0.0 }
  0xe7   : > { %v1437_v25 = vpop.f32.mrb[2].mxu0  ;;  %v581_v29 = vmax.f32 %v454_v24, 0.0  ;;  %v1452_v34 = vpop.f32.mrb[0].mxu1 }
  0xe8   : > { %v584_v27 = vmax.f32 %v1437_v25, 0.0  ;;  %v457_v28 = vpop.f32.mrb[3].mxu0  ;;  %v599_v36 = vmax.f32 %v1452_v34, 0.0  ;;  %v518_v37 = vpop.f32.mrb[1].mxu1 }
  0xe9   : > { %v582_v30 = vmax.f32 %v457_v28, 0.0  ;;  %v597_v39 = vmax.f32 %v518_v37, 0.0  ;;  %v1453_v40 = vpop.f32.mrb[2].mxu1 }
  0xea   : > { %v614_v31 = vpack.c.bf16 %v584_v27, %v583_v26  ;;  %v600_v44 = vmax.f32 %v1453_v40, 0.0  ;;  %v521_v45 = vpop.f32.mrb[3].mxu1 }
  0xeb   : > { %v613_v32 = vpack.c.bf16 %v582_v30, %v581_v29  ;;  %v598_v48 = vmax.f32 %v521_v45, 0.0 }
  0xec   : > { %v622_v50 = vpack.c.bf16 %v600_v44, %v599_v36 }
  0xed   : > { %v1440_v33 = vpop.f32.mrb[4].mxu0  ;;  %1474 = vmatprep.mubr.msk.bf16.mxu1 %vm661_vm1, %v613_v32  ;;  %v621_v52 = vpack.c.bf16 %v598_v48, %v597_v39 }
  0xee   : > { %v470_v35 = vpop.f32.mrb[5].mxu0  ;;  %1475 = vmatmul.mubr.msk.bf16.vlgmr.msra.gmra.mrb[16].mxu1 %vm661_vm1, %v614_v31  ;;  %v587_v41 = vmax.f32 %v1440_v33, 0.0 }
  0xef   : > { %v1441_v38 = vpop.f32.mrb[6].mxu0  ;;  %v585_v46 = vmax.f32 %v470_v35, 0.0  ;;  %v1456_v54 = vpop.f32.mrb[4].mxu1 }
  0xf0   : > { %v588_v42 = vmax.f32 %v1441_v38, 0.0  ;;  %v473_v43 = vpop.f32.mrb[7].mxu0  ;;  %v603_v56 = vmax.f32 %v1456_v54, 0.0  ;;  %v534_v57 = vpop.f32.mrb[5].mxu1 }
  0xf1   : > { %v586_v47 = vmax.f32 %v473_v43, 0.0  ;;  %v601_v59 = vmax.f32 %v534_v57, 0.0  ;;  %v1457_v60 = vpop.f32.mrb[6].mxu1 }
  0xf2   : > { %v616_v49 = vpack.c.bf16 %v588_v42, %v587_v41  ;;  %v604_v0 = vmax.f32 %v1457_v60, 0.0  ;;  %v537_v1 = vpop.f32.mrb[7].mxu1 }
  0xf3   : > { %v615_v51 = vpack.c.bf16 %v586_v47, %v585_v46  ;;  %v602_v4 = vmax.f32 %v537_v1, 0.0 }
  0xf4   : > { %v624_v6 = vpack.c.bf16 %v604_v0, %v603_v56 }
  0xf5   : > { %v1444_v53 = vpop.f32.mrb[8].mxu0  ;;  %1478 = vmatprep.mubr.msk.bf16.mxu1 %vm661_vm1, %v615_v51  ;;  %v623_v8 = vpack.c.bf16 %v602_v4, %v601_v59 }
  0xf6   : > { %v486_v55 = vpop.f32.mrb[9].mxu0  ;;  %1479 = vmatmul.mubr.msk.bf16.gmra.mrb[20].mxu1 %vm661_vm1, %v616_v49  ;;  %v591_v61 = vmax.f32 %v1444_v53, 0.0 }
  0xf7   : > { %v1445_v58 = vpop.f32.mrb[10].mxu0  ;;  %v589_v2 = vmax.f32 %v486_v55, 0.0  ;;  %v1460_v10 = vpop.f32.mrb[8].mxu1 }
  0xf8   : > { %v592_v62 = vmax.f32 %v1445_v58, 0.0  ;;  %v489_v63 = vpop.f32.mrb[11].mxu0  ;;  %v607_v12 = vmax.f32 %v1460_v10, 0.0  ;;  %v550_v13 = vpop.f32.mrb[9].mxu1 }
  0xf9   : > { %v590_v3 = vmax.f32 %v489_v63, 0.0  ;;  %v605_v15 = vmax.f32 %v550_v13, 0.0  ;;  %v1461_v16 = vpop.f32.mrb[10].mxu1 }
  0xfa   : > { %v618_v5 = vpack.c.bf16 %v592_v62, %v591_v61  ;;  %v608_v20 = vmax.f32 %v1461_v16, 0.0  ;;  %v553_v21 = vpop.f32.mrb[11].mxu1 }
  0xfb   : > { %v617_v7 = vpack.c.bf16 %v590_v3, %v589_v2  ;;  %v606_v24 = vmax.f32 %v553_v21, 0.0 }
  0xfc   : > { %v626_v26 = vpack.c.bf16 %v608_v20, %v607_v12 }
  0xfd   : > { %v1448_v9 = vpop.f32.mrb[12].mxu0  ;;  %1482 = vmatprep.mubr.msk.bf16.mxu1 %vm661_vm1, %v617_v7  ;;  %v625_v28 = vpack.c.bf16 %v606_v24, %v605_v15 }
  0xfe   : > { %v502_v11 = vpop.f32.mrb[13].mxu0  ;;  %1483 = vmatmul.mubr.msk.bf16.gmra.mrb[24].mxu1 %vm661_vm1, %v618_v5  ;;  %v595_v17 = vmax.f32 %v1448_v9, 0.0 }
  0xff   : > { %v1449_v14 = vpop.f32.mrb[14].mxu0  ;;  %v593_v22 = vmax.f32 %v502_v11, 0.0  ;;  %v1464_v29 = vpop.f32.mrb[12].mxu1 }
 0x100   : > { %v596_v18 = vmax.f32 %v1449_v14, 0.0  ;;  %v505_v19 = vpop.f32.mrb[15].mxu0  ;;  %v611_v30 = vmax.f32 %v1464_v29, 0.0  ;;  %v566_v31 = vpop.f32.mrb[13].mxu1 }
 0x101   : > { %v594_v23 = vmax.f32 %v505_v19, 0.0  ;;  %v609_v32 = vmax.f32 %v566_v31, 0.0  ;;  %v1465_v33 = vpop.f32.mrb[14].mxu1 }
 0x102   : > { %v620_v25 = vpack.c.bf16 %v596_v18, %v595_v17  ;;  %v612_v34 = vmax.f32 %v1465_v33, 0.0  ;;  %v569_v35 = vpop.f32.mrb[15].mxu1 }
 0x103   : > { %v619_v27 = vpack.c.bf16 %v594_v23, %v593_v22  ;;  %v610_v36 = vmax.f32 %v569_v35, 0.0 }
 0x104   : > { %v628_v37 = vpack.c.bf16 %v612_v34, %v611_v30 }
 0x105   : > { %1486 = vmatprep.mubr.msk.bf16.mxu1 %vm661_vm1, %v619_v27  ;;  %v627_v38 = vpack.c.bf16 %v610_v36, %v609_v32 }
 0x106   : > { %1487 = vmatmul.mubr.msk.bf16.gmra.mrb[28].mxu1 %vm661_vm1, %v620_v25 }
 0x107   : > { %1490 = vmatprep.mubr.msk.bf16.mxu1 %vm661_vm1, %v621_v52 }
 0x10e   : > { %1491 = vmatmul.mubr.msk.bf16.gmra.mrb[32].mxu1 %vm661_vm1, %v622_v50 }
 0x10f   : > { %1494 = vmatprep.mubr.msk.bf16.mxu1 %vm661_vm1, %v623_v8 }
 0x116   : > { %1495 = vmatmul.mubr.msk.bf16.gmra.mrb[36].mxu1 %vm661_vm1, %v624_v6 }
 0x117   : > { %1498 = vmatprep.mubr.msk.bf16.mxu1 %vm661_vm1, %v625_v28 }
 0x11e   : > { %1499 = vmatmul.mubr.msk.bf16.gmra.mrb[40].mxu1 %vm661_vm1, %v626_v26 }
 0x11f   : > { %1502 = vmatprep.mubr.msk.bf16.mxu1 %vm661_vm1, %v627_v38 }
 0x126   : > { %1503 = vmatmul.mubr.msk.bf16.gmra.mrb[44].mxu1 %vm661_vm1, %v628_v37 }
 0x1c1   : > { %v1476_v39 = vpop.f32.mrb[16].mxu1 }
 0x1c2   : > { %v873_v40 = vmax.f32 %v1476_v39, 0.0  ;;  %v744_v41 = vpop.f32.mrb[17].mxu1 }
 0x1c3   : > { %v871_v42 = vmax.f32 %v744_v41, 0.0  ;;  %v1477_v43 = vpop.f32.mrb[18].mxu1 }
 0x1c4   : > { %906 = vst.msk [vmem:[%s1704_s17 + $0x10] sm:$0xff] %vm903_vm2, %v873_v40  ;;  %v874_v44 = vmax.f32 %v1477_v43, 0.0  ;;  %v747_v45 = vpop.f32.mrb[19].mxu1 }
 0x1c5   : > { %904 = vst.msk [vmem:[%s1704_s17] sm:$0xff] %vm903_vm2, %v871_v42  ;;  %v872_v46 = vmax.f32 %v747_v45, 0.0 }
 0x1c6   : > { %907 = vst.msk [vmem:[%s1704_s17 + $0x18] sm:$0xff] %vm903_vm2, %v874_v44  ;;  %v937_v47 = vpack.c.bf16 %v874_v44, %v873_v40 }
 0x1c7   : > { %905 = vst.msk [vmem:[%s1704_s17 + $0x8] sm:$0xff] %vm903_vm2, %v872_v46  ;;  %v936_v48 = vpack.c.bf16 %v872_v46, %v871_v42 }
 0x1c9   : > { %v1480_v49 = vpop.f32.mrb[20].mxu1  ;;  %1508 = vmatprep.mubr.msk.bf16.mxu0 %vm903_vm2, %v936_v48 }
 0x1ca   : > { %v877_v50 = vmax.f32 %v1480_v49, 0.0  ;;  %v760_v51 = vpop.f32.mrb[21].mxu1  ;;  %1509 = vmatmul.mubr.msk.bf16.vlgmr.msra.gmra.mrb[16].mxu0 %vm903_vm2, %v937_v47 }
 0x1cb   : > { %v875_v52 = vmax.f32 %v760_v51, 0.0  ;;  %v1481_v53 = vpop.f32.mrb[22].mxu1 }
 0x1cc   : > { %910 = vst.msk [vmem:[%s1704_s17 + $0x30] sm:$0xff] %vm903_vm2, %v877_v50  ;;  %v878_v54 = vmax.f32 %v1481_v53, 0.0  ;;  %v763_v55 = vpop.f32.mrb[23].mxu1 }
 0x1cd   : > { %908 = vst.msk [vmem:[%s1704_s17 + $0x20] sm:$0xff] %vm903_vm2, %v875_v52  ;;  %v876_v56 = vmax.f32 %v763_v55, 0.0 }
 0x1ce   : > { %911 = vst.msk [vmem:[%s1704_s17 + $0x38] sm:$0xff] %vm903_vm2, %v878_v54  ;;  %v939_v57 = vpack.c.bf16 %v878_v54, %v877_v50 }
 0x1cf   : > { %909 = vst.msk [vmem:[%s1704_s17 + $0x28] sm:$0xff] %vm903_vm2, %v876_v56  ;;  %v938_v58 = vpack.c.bf16 %v876_v56, %v875_v52 }
 0x1d1   : > { %v1484_v59 = vpop.f32.mrb[24].mxu1  ;;  %1512 = vmatprep.mubr.msk.bf16.mxu0 %vm903_vm2, %v938_v58 }
 0x1d2   : > { %v881_v60 = vmax.f32 %v1484_v59, 0.0  ;;  %v776_v61 = vpop.f32.mrb[25].mxu1  ;;  %1513 = vmatmul.mubr.msk.bf16.gmra.mrb[20].mxu0 %vm903_vm2, %v939_v57 }
 0x1d3   : > { %v879_v62 = vmax.f32 %v776_v61, 0.0  ;;  %v1485_v63 = vpop.f32.mrb[26].mxu1 }
 0x1d4   : > { %914 = vst.msk [vmem:[%s1704_s17 + $0x50] sm:$0xff] %vm903_vm2, %v881_v60  ;;  %v882_v0 = vmax.f32 %v1485_v63, 0.0  ;;  %v779_v1 = vpop.f32.mrb[27].mxu1 }
 0x1d5   : > { %912 = vst.msk [vmem:[%s1704_s17 + $0x40] sm:$0xff] %vm903_vm2, %v879_v62  ;;  %v880_v2 = vmax.f32 %v779_v1, 0.0 }
 0x1d6   : > { %915 = vst.msk [vmem:[%s1704_s17 + $0x58] sm:$0xff] %vm903_vm2, %v882_v0  ;;  %v941_v3 = vpack.c.bf16 %v882_v0, %v881_v60 }
 0x1d7   : > { %913 = vst.msk [vmem:[%s1704_s17 + $0x48] sm:$0xff] %vm903_vm2, %v880_v2  ;;  %v940_v4 = vpack.c.bf16 %v880_v2, %v879_v62 }
 0x1d9   : > { %v1488_v5 = vpop.f32.mrb[28].mxu1  ;;  %1516 = vmatprep.mubr.msk.bf16.mxu0 %vm903_vm2, %v940_v4 }
 0x1da   : > { %v885_v6 = vmax.f32 %v1488_v5, 0.0  ;;  %v792_v7 = vpop.f32.mrb[29].mxu1  ;;  %1517 = vmatmul.mubr.msk.bf16.gmra.mrb[24].mxu0 %vm903_vm2, %v941_v3 }
 0x1db   : > { %v883_v8 = vmax.f32 %v792_v7, 0.0  ;;  %v1489_v9 = vpop.f32.mrb[30].mxu1 }
 0x1dc   : > { %918 = vst.msk [vmem:[%s1704_s17 + $0x70] sm:$0xff] %vm903_vm2, %v885_v6  ;;  %v886_v10 = vmax.f32 %v1489_v9, 0.0  ;;  %v795_v11 = vpop.f32.mrb[31].mxu1 }
 0x1dd   : > { %916 = vst.msk [vmem:[%s1704_s17 + $0x60] sm:$0xff] %vm903_vm2, %v883_v8  ;;  %v884_v12 = vmax.f32 %v795_v11, 0.0 }
 0x1de   : > { %919 = vst.msk [vmem:[%s1704_s17 + $0x78] sm:$0xff] %vm903_vm2, %v886_v10  ;;  %v943_v13 = vpack.c.bf16 %v886_v10, %v885_v6 }
 0x1df   : > { %917 = vst.msk [vmem:[%s1704_s17 + $0x68] sm:$0xff] %vm903_vm2, %v884_v12  ;;  %v942_v14 = vpack.c.bf16 %v884_v12, %v883_v8 }
 0x1e1   : > { %v1492_v15 = vpop.f32.mrb[32].mxu1  ;;  %1520 = vmatprep.mubr.msk.bf16.mxu0 %vm903_vm2, %v942_v14 }
 0x1e2   : > { %v889_v16 = vmax.f32 %v1492_v15, 0.0  ;;  %v808_v17 = vpop.f32.mrb[33].mxu1  ;;  %1521 = vmatmul.mubr.msk.bf16.gmra.mrb[28].mxu0 %vm903_vm2, %v943_v13 }
 0x1e3   : > { %v887_v18 = vmax.f32 %v808_v17, 0.0  ;;  %v1493_v19 = vpop.f32.mrb[34].mxu1 }
 0x1e4   : > { %922 = vst.msk [vmem:[%s1704_s17 + $0x90] sm:$0xff] %vm903_vm2, %v889_v16  ;;  %v890_v20 = vmax.f32 %v1493_v19, 0.0  ;;  %v811_v21 = vpop.f32.mrb[35].mxu1 }
 0x1e5   : > { %920 = vst.msk [vmem:[%s1704_s17 + $0x80] sm:$0xff] %vm903_vm2, %v887_v18  ;;  %v888_v22 = vmax.f32 %v811_v21, 0.0 }
 0x1e6   : > { %923 = vst.msk [vmem:[%s1704_s17 + $0x98] sm:$0xff] %vm903_vm2, %v890_v20  ;;  %v945_v23 = vpack.c.bf16 %v890_v20, %v889_v16 }
 0x1e7   : > { %921 = vst.msk [vmem:[%s1704_s17 + $0x88] sm:$0xff] %vm903_vm2, %v888_v22  ;;  %v944_v24 = vpack.c.bf16 %v888_v22, %v887_v18 }
 0x1e9   : > { %v1496_v25 = vpop.f32.mrb[36].mxu1  ;;  %1524 = vmatprep.mubr.msk.bf16.mxu0 %vm903_vm2, %v944_v24 }
 0x1ea   : > { %v893_v26 = vmax.f32 %v1496_v25, 0.0  ;;  %v824_v27 = vpop.f32.mrb[37].mxu1  ;;  %1525 = vmatmul.mubr.msk.bf16.gmra.mrb[32].mxu0 %vm903_vm2, %v945_v23 }
 0x1eb   : > { %v891_v28 = vmax.f32 %v824_v27, 0.0  ;;  %v1497_v29 = vpop.f32.mrb[38].mxu1 }
 0x1ec   : > { %926 = vst.msk [vmem:[%s1704_s17 + $0xb0] sm:$0xff] %vm903_vm2, %v893_v26  ;;  %v894_v30 = vmax.f32 %v1497_v29, 0.0  ;;  %v827_v31 = vpop.f32.mrb[39].mxu1 }
 0x1ed   : > { %924 = vst.msk [vmem:[%s1704_s17 + $0xa0] sm:$0xff] %vm903_vm2, %v891_v28  ;;  %v892_v32 = vmax.f32 %v827_v31, 0.0 }
 0x1ee   : > { %927 = vst.msk [vmem:[%s1704_s17 + $0xb8] sm:$0xff] %vm903_vm2, %v894_v30  ;;  %v947_v33 = vpack.c.bf16 %v894_v30, %v893_v26 }
 0x1ef   : > { %925 = vst.msk [vmem:[%s1704_s17 + $0xa8] sm:$0xff] %vm903_vm2, %v892_v32  ;;  %v946_v34 = vpack.c.bf16 %v892_v32, %v891_v28 }
 0x1f1   : > { %v1500_v35 = vpop.f32.mrb[40].mxu1  ;;  %1528 = vmatprep.mubr.msk.bf16.mxu0 %vm903_vm2, %v946_v34 }
 0x1f2   : > { %v897_v36 = vmax.f32 %v1500_v35, 0.0  ;;  %v840_v37 = vpop.f32.mrb[41].mxu1  ;;  %1529 = vmatmul.mubr.msk.bf16.gmra.mrb[36].mxu0 %vm903_vm2, %v947_v33 }
 0x1f3   : > { %v895_v38 = vmax.f32 %v840_v37, 0.0  ;;  %v1501_v39 = vpop.f32.mrb[42].mxu1 }
 0x1f4   : > { %930 = vst.msk [vmem:[%s1704_s17 + $0xd0] sm:$0xff] %vm903_vm2, %v897_v36  ;;  %v898_v40 = vmax.f32 %v1501_v39, 0.0  ;;  %v843_v41 = vpop.f32.mrb[43].mxu1 }
 0x1f5   : > { %928 = vst.msk [vmem:[%s1704_s17 + $0xc0] sm:$0xff] %vm903_vm2, %v895_v38  ;;  %v896_v42 = vmax.f32 %v843_v41, 0.0 }
 0x1f6   : > { %931 = vst.msk [vmem:[%s1704_s17 + $0xd8] sm:$0xff] %vm903_vm2, %v898_v40  ;;  %v949_v43 = vpack.c.bf16 %v898_v40, %v897_v36 }
 0x1f7   : > { %929 = vst.msk [vmem:[%s1704_s17 + $0xc8] sm:$0xff] %vm903_vm2, %v896_v42  ;;  %v948_v44 = vpack.c.bf16 %v896_v42, %v895_v38 }
 0x1f9   : > { %v1504_v45 = vpop.f32.mrb[44].mxu1  ;;  %1532 = vmatprep.mubr.msk.bf16.mxu0 %vm903_vm2, %v948_v44 }
 0x1fa   : > { %v901_v46 = vmax.f32 %v1504_v45, 0.0  ;;  %v856_v47 = vpop.f32.mrb[45].mxu1  ;;  %1533 = vmatmul.mubr.msk.bf16.gmra.mrb[40].mxu0 %vm903_vm2, %v949_v43 }
 0x1fb   : > { %v899_v48 = vmax.f32 %v856_v47, 0.0  ;;  %v1505_v49 = vpop.f32.mrb[46].mxu1 }
 0x1fc   : > { %934 = vst.msk [vmem:[%s1704_s17 + $0xf0] sm:$0xff] %vm903_vm2, %v901_v46  ;;  %v902_v50 = vmax.f32 %v1505_v49, 0.0  ;;  %v859_v51 = vpop.f32.mrb[47].mxu1 }
 0x1fd   : > { %932 = vst.msk [vmem:[%s1704_s17 + $0xe0] sm:$0xff] %vm903_vm2, %v899_v48  ;;  %v900_v52 = vmax.f32 %v859_v51, 0.0 }
 0x1fe   : > { %935 = vst.msk [vmem:[%s1704_s17 + $0xf8] sm:$0xff] %vm903_vm2, %v902_v50  ;;  %v951_v53 = vpack.c.bf16 %v902_v50, %v901_v46 }
 0x1ff   : > { %933 = vst.msk [vmem:[%s1704_s17 + $0xe8] sm:$0xff] %vm903_vm2, %v900_v52  ;;  %v950_v54 = vpack.c.bf16 %v900_v52, %v899_v48 }
 0x201   : > { %1536 = vmatprep.mubr.msk.bf16.mxu0 %vm903_vm2, %v950_v54 }
 0x202   : > { %1537 = vmatmul.mubr.msk.bf16.gmra.mrb[44].mxu0 %vm903_vm2, %v951_v53 }
 0x29d   : > { %v1510_v55 = vpop.f32.mrb[16].mxu0 }
 0x29e   : > { %1171 = vst.msk [vmem:[%s1791_s21 + $0x10] sm:$0xff] %vm371_vm0, %v1510_v55  ;;  %v1042_v56 = vpop.f32.mrb[17].mxu0 }
 0x29f   : > { %1169 = vst.msk [vmem:[%s1791_s21] sm:$0xff] %vm371_vm0, %v1042_v56  ;;  %v1511_v57 = vpop.f32.mrb[18].mxu0 }
 0x2a0   : > { %1172 = vst.msk [vmem:[%s1791_s21 + $0x18] sm:$0xff] %vm371_vm0, %v1511_v57  ;;  %v1045_v58 = vpop.f32.mrb[19].mxu0 }
 0x2a1   : > { %1170 = vst.msk [vmem:[%s1791_s21 + $0x8] sm:$0xff] %vm371_vm0, %v1045_v58 }
 0x2a5   : > { %v1514_v59 = vpop.f32.mrb[20].mxu0 }
 0x2a6   : > { %1175 = vst.msk [vmem:[%s1791_s21 + $0x30] sm:$0xff] %vm371_vm0, %v1514_v59  ;;  %v1058_v60 = vpop.f32.mrb[21].mxu0 }
 0x2a7   : > { %1173 = vst.msk [vmem:[%s1791_s21 + $0x20] sm:$0xff] %vm371_vm0, %v1058_v60  ;;  %v1515_v61 = vpop.f32.mrb[22].mxu0 }
 0x2a8   : > { %1176 = vst.msk [vmem:[%s1791_s21 + $0x38] sm:$0xff] %vm371_vm0, %v1515_v61  ;;  %v1061_v62 = vpop.f32.mrb[23].mxu0 }
 0x2a9   : > { %1174 = vst.msk [vmem:[%s1791_s21 + $0x28] sm:$0xff] %vm371_vm0, %v1061_v62 }
 0x2ad   : > { %v1518_v63 = vpop.f32.mrb[24].mxu0 }
 0x2ae   : > { %1179 = vst.msk [vmem:[%s1791_s21 + $0x50] sm:$0xff] %vm371_vm0, %v1518_v63  ;;  %v1074_v0 = vpop.f32.mrb[25].mxu0 }
 0x2af   : > { %1177 = vst.msk [vmem:[%s1791_s21 + $0x40] sm:$0xff] %vm371_vm0, %v1074_v0  ;;  %v1519_v1 = vpop.f32.mrb[26].mxu0 }
 0x2b0   : > { %1180 = vst.msk [vmem:[%s1791_s21 + $0x58] sm:$0xff] %vm371_vm0, %v1519_v1  ;;  %v1077_v2 = vpop.f32.mrb[27].mxu0 }
 0x2b1   : > { %1178 = vst.msk [vmem:[%s1791_s21 + $0x48] sm:$0xff] %vm371_vm0, %v1077_v2 }
 0x2b5   : > { %v1522_v3 = vpop.f32.mrb[28].mxu0 }
 0x2b6   : > { %1183 = vst.msk [vmem:[%s1791_s21 + $0x70] sm:$0xff] %vm371_vm0, %v1522_v3  ;;  %v1090_v4 = vpop.f32.mrb[29].mxu0 }
 0x2b7   : > { %1181 = vst.msk [vmem:[%s1791_s21 + $0x60] sm:$0xff] %vm371_vm0, %v1090_v4  ;;  %v1523_v5 = vpop.f32.mrb[30].mxu0 }
 0x2b8   : > { %1184 = vst.msk [vmem:[%s1791_s21 + $0x78] sm:$0xff] %vm371_vm0, %v1523_v5  ;;  %v1093_v6 = vpop.f32.mrb[31].mxu0 }
 0x2b9   : > { %1182 = vst.msk [vmem:[%s1791_s21 + $0x68] sm:$0xff] %vm371_vm0, %v1093_v6 }
 0x2bd   : > { %v1526_v7 = vpop.f32.mrb[32].mxu0 }
 0x2be   : > { %1187 = vst.msk [vmem:[%s1791_s21 + $0x90] sm:$0xff] %vm371_vm0, %v1526_v7  ;;  %v1106_v8 = vpop.f32.mrb[33].mxu0 }
 0x2bf   : > { %1185 = vst.msk [vmem:[%s1791_s21 + $0x80] sm:$0xff] %vm371_vm0, %v1106_v8  ;;  %v1527_v9 = vpop.f32.mrb[34].mxu0 }
 0x2c0   : > { %1188 = vst.msk [vmem:[%s1791_s21 + $0x98] sm:$0xff] %vm371_vm0, %v1527_v9  ;;  %v1109_v10 = vpop.f32.mrb[35].mxu0 }
 0x2c1   : > { %1186 = vst.msk [vmem:[%s1791_s21 + $0x88] sm:$0xff] %vm371_vm0, %v1109_v10 }
 0x2c5   : > { %v1530_v11 = vpop.f32.mrb[36].mxu0 }
 0x2c6   : > { %1191 = vst.msk [vmem:[%s1791_s21 + $0xb0] sm:$0xff] %vm371_vm0, %v1530_v11  ;;  %v1122_v12 = vpop.f32.mrb[37].mxu0 }
 0x2c7   : > { %1189 = vst.msk [vmem:[%s1791_s21 + $0xa0] sm:$0xff] %vm371_vm0, %v1122_v12  ;;  %v1531_v13 = vpop.f32.mrb[38].mxu0 }
 0x2c8   : > { %1192 = vst.msk [vmem:[%s1791_s21 + $0xb8] sm:$0xff] %vm371_vm0, %v1531_v13  ;;  %v1125_v14 = vpop.f32.mrb[39].mxu0 }
 0x2c9   : > { %1190 = vst.msk [vmem:[%s1791_s21 + $0xa8] sm:$0xff] %vm371_vm0, %v1125_v14 }
 0x2cd   : > { %v1534_v15 = vpop.f32.mrb[40].mxu0 }
 0x2ce   : > { %1195 = vst.msk [vmem:[%s1791_s21 + $0xd0] sm:$0xff] %vm371_vm0, %v1534_v15  ;;  %v1138_v16 = vpop.f32.mrb[41].mxu0 }
 0x2cf   : > { %1193 = vst.msk [vmem:[%s1791_s21 + $0xc0] sm:$0xff] %vm371_vm0, %v1138_v16  ;;  %v1535_v17 = vpop.f32.mrb[42].mxu0 }
 0x2d0   : > { %1196 = vst.msk [vmem:[%s1791_s21 + $0xd8] sm:$0xff] %vm371_vm0, %v1535_v17  ;;  %v1141_v18 = vpop.f32.mrb[43].mxu0 }
 0x2d1   : > { %1194 = vst.msk [vmem:[%s1791_s21 + $0xc8] sm:$0xff] %vm371_vm0, %v1141_v18 }
 0x2d5   : > { %v1538_v19 = vpop.f32.mrb[44].mxu0 }
 0x2d6   : > { %1199 = vst.msk [vmem:[%s1791_s21 + $0xf0] sm:$0xff] %vm371_vm0, %v1538_v19  ;;  %v1154_v20 = vpop.f32.mrb[45].mxu0 }
 0x2d7   : > { %1197 = vst.msk [vmem:[%s1791_s21 + $0xe0] sm:$0xff] %vm371_vm0, %v1154_v20  ;;  %v1539_v21 = vpop.f32.mrb[46].mxu0 }
 0x2d8   : > { %1200 = vst.msk [vmem:[%s1791_s21 + $0xf8] sm:$0xff] %vm371_vm0, %v1539_v21  ;;  %v1157_v22 = vpop.f32.mrb[47].mxu0 }
 0x2d9   : > { %1198 = vst.msk [vmem:[%s1791_s21 + $0xe8] sm:$0xff] %vm371_vm0, %v1157_v22 }
 0x2da PF: > { %s16_s18 = sadd.s32 1, %s1581_s18  }
 0x2db   : > { %p13_p4 = scmp.ge.s32.totalorder %s16_s18, 4  }
 0x2dd   :  { %15 = sbr.rel (!%p13_p4) target bundleno = 1 (0x1), region = 78 }

</bundles_post_ra>
